<compile_context>
chip_gen: v7x
topology: tpu7x:2x2x1
jax: 0.10.0
libtpu: 0.0.40
codegen_flags: <defaults>
</compile_context>

<pallas_src>
import functools

import jax
import jax.numpy as jnp
from jax.experimental import pallas as pl
from jax.experimental.pallas import tpu as pltpu


def _pick_spatial_tile(hw, K, cout, *, max_tile=2048, vmem_budget=20 * 1024 * 1024):
    """Largest multiple-of-128 divisor of `hw` that fits the VMEM budget.

    Per unit of tile T the pipelined kernel needs (double-buffered):
      patches: 2 * K * T * 2 bytes (bf16)   conv out: 2 * Cout * T * 2 bytes (bf16)
    Falls back to the full extent when hw has no multiple-of-128 divisor
    (block == full array dim is always legal).
    """
    per_t = 4 * K + 4 * cout
    cap = max(128, (vmem_budget // per_t) // 128 * 128)
    cap = min(cap, max_tile, hw)
    best = None
    t = 128
    while t <= cap:
        if hw % t == 0:
            best = t
        t += 128
    return best if best is not None else hw


def _conv_stats_kernel(p_ref, w_ref, y_ref, sum_ref, sq_ref):
    """One im2col matmul tile + per-channel partial statistics.

    p_ref  : (1, K, T)        bf16  im2col patches (K = k*k*Cin, T = spatial tile)
    w_ref  : (Cout, K)        bf16  filters
    y_ref  : (1, Cout, T)     bf16  conv output tile (lane-dense: spatial on lanes)
    sum_ref: (1, 1, Cout, 1)  f32   per-channel partial sum for this tile
    sq_ref : (1, 1, Cout, 1)  f32   per-channel partial sum of squares for this tile
    """
    y = jnp.dot(w_ref[...], p_ref[0], preferred_element_type=jnp.float32)  # (Cout, T) f32
    # Statistics from the f32 accumulator (before the bf16 storage cast) -> exact BN fold.
    sum_ref[0, 0] = jnp.sum(y, axis=1, keepdims=True)
    sq_ref[0, 0] = jnp.sum(y * y, axis=1, keepdims=True)
    y_ref[0] = y.astype(y_ref.dtype)


def _bn_relu_kernel(y_ref, scale_ref, bias_ref, o_ref):
    """Fused folded batch-norm (per-channel affine) + ReLU, lane-dense layout.

    y_ref : (1, Cout, T) bf16 ; o_ref : (1, Cout, T) f32
    scale_ref / bias_ref : (1, Cout, 1) f32
    """
    y = y_ref[...].astype(jnp.float32)
    o_ref[...] = jnp.maximum(y * scale_ref[...] + bias_ref[...], 0.0)


def convolution_forward(x_nchw, w_oihw, gamma, beta, *, k, stride=1, eps=1e-5):
    """Forward pass equivalent to the PyTorch `convolution` module (with_bn=True)."""
    assert stride == 1, "only stride=1 (the module default) is implemented"
    # TODO(synk): stride > 1 would need a strided im2col in the wrapper.
    N, Cin, H, W = x_nchw.shape
    Cout = w_oihw.shape[0]
    pad = (k - 1) // 2
    Ho = (H + 2 * pad - k) // stride + 1
    Wo = (W + 2 * pad - k) // stride + 1
    HW = Ho * Wo
    K = k * k * Cin

    # ---- glue (XLA, off the critical path): zero-pad + im2col, NCHW-flat, bf16 ----
    xp = jnp.pad(x_nchw.astype(jnp.float32), ((0, 0), (0, 0), (pad, pad), (pad, pad)))
    taps = [xp[:, :, kh:kh + Ho, kw:kw + Wo] for kh in range(k) for kw in range(k)]
    patches = jnp.concatenate(taps, axis=1).reshape(N, K, HW).astype(jnp.bfloat16)
    # (Cout, Cin, kh, kw) -> (Cout, kh, kw, Cin) -> (Cout, K); K index = (kh*k+kw)*Cin + ci
    w = jnp.transpose(w_oihw.astype(jnp.float32), (0, 2, 3, 1)).reshape(Cout, K)
    w = w.astype(jnp.bfloat16)

    T = _pick_spatial_tile(HW, K, Cout)
    n_t = HW // T
    grid = (N, n_t)
    cparams = pltpu.CompilerParams(
        dimension_semantics=("parallel", "parallel"),
        vmem_limit_bytes=32 * 1024 * 1024,
    )

    # ---- Pallas kernel 1: conv (single bf16 MXU matmul per tile) + channel stats ----
    conv_flat, psum, psq = pl.pallas_call(
        _conv_stats_kernel,
        out_shape=(
            jax.ShapeDtypeStruct((N, Cout, HW), jnp.bfloat16),
            jax.ShapeDtypeStruct((N, n_t, Cout, 1), jnp.float32),
            jax.ShapeDtypeStruct((N, n_t, Cout, 1), jnp.float32),
        ),
        grid=grid,
        in_specs=[
            pl.BlockSpec((1, K, T), lambda n, t: (n, 0, t)),
            pl.BlockSpec((Cout, K), lambda n, t: (0, 0)),
        ],
        out_specs=(
            pl.BlockSpec((1, Cout, T), lambda n, t: (n, 0, t)),
            pl.BlockSpec((1, 1, Cout, 1), lambda n, t: (n, t, 0, 0)),
            pl.BlockSpec((1, 1, Cout, 1), lambda n, t: (n, t, 0, 0)),
        ),
        compiler_params=cparams,
    )(patches, w)

    # ---- glue: fold BatchNorm2d training-mode batch stats (biased variance) ----
    cnt = jnp.float32(N * HW)
    mean = jnp.sum(psum, axis=(0, 1, 3)) / cnt                  # (Cout,)
    ex2 = jnp.sum(psq, axis=(0, 1, 3)) / cnt                    # (Cout,)
    var = jnp.maximum(ex2 - mean * mean, 0.0)
    scale = gamma.astype(jnp.float32) * jax.lax.rsqrt(var + eps)
    bias = beta.astype(jnp.float32) - mean * scale
    scale3 = scale.reshape(1, Cout, 1)
    bias3 = bias.reshape(1, Cout, 1)

    # ---- Pallas kernel 2: fused folded-BN + ReLU (lane-dense elementwise) ----
    out_flat = pl.pallas_call(
        _bn_relu_kernel,
        out_shape=jax.ShapeDtypeStruct((N, Cout, HW), jnp.float32),
        grid=grid,
        in_specs=[
            pl.BlockSpec((1, Cout, T), lambda n, t: (n, 0, t)),
            pl.BlockSpec((1, Cout, 1), lambda n, t: (0, 0, 0)),
            pl.BlockSpec((1, Cout, 1), lambda n, t: (0, 0, 0)),
        ],
        out_specs=pl.BlockSpec((1, Cout, T), lambda n, t: (n, 0, t)),
        compiler_params=cparams,
    )(conv_flat, scale3, bias3)

    # flattened NCHW -> NCHW (pure metadata reshape, no transpose needed)
    return out_flat.reshape(N, Cout, Ho, Wo)


def _reference_forward(x_nchw, w_oihw, gamma, beta, *, k, stride=1, eps=1e-5):
    """Plain-JAX reference matching PyTorch semantics (for a sanity check)."""
    pad = (k - 1) // 2
    conv = jax.lax.conv_general_dilated(
        x_nchw.astype(jnp.float32), w_oihw.astype(jnp.float32),
        window_strides=(stride, stride), padding=((pad, pad), (pad, pad)),
        dimension_numbers=("NCHW", "OIHW", "NCHW"),
        precision=jax.lax.Precision.HIGHEST,
    )
    mean = jnp.mean(conv, axis=(0, 2, 3), keepdims=True)
    var = jnp.mean(jnp.square(conv - mean), axis=(0, 2, 3), keepdims=True)
    bn = (conv - mean) * jax.lax.rsqrt(var + eps)
    bn = bn * gamma.reshape(1, -1, 1, 1) + beta.reshape(1, -1, 1, 1)
    return jnp.maximum(bn, 0.0)


if __name__ == "__main__":
    # module config: convolution(k=3, inp_dim=4, out_dim=8, stride=1, with_bn=True)
    k, inp_dim, out_dim, stride = 3, 4, 8, 1
    N, H, W = 2, 16, 16

    key = jax.random.PRNGKey(0)
    kx, kw_, kg, kb = jax.random.split(key, 4)
    x = jax.random.normal(kx, (N, inp_dim, H, W), dtype=jnp.float32)
    w = 0.1 * jax.random.normal(kw_, (out_dim, inp_dim, k, k), dtype=jnp.float32)
    gamma = 1.0 + 0.1 * jax.random.normal(kg, (out_dim,), dtype=jnp.float32)
    beta = 0.1 * jax.random.normal(kb, (out_dim,), dtype=jnp.float32)

    fwd = jax.jit(functools.partial(convolution_forward, k=k, stride=stride))
    out = jax.block_until_ready(fwd(x, w, gamma, beta))

    ref = _reference_forward(x, w, gamma, beta, k=k, stride=stride)
    assert out.shape == (N, out_dim, H, W)
    # bf16 MXU operands + bf16 conv intermediate vs a HIGHEST-precision f32 reference
    # -> tolerance loosened accordingly (errors observed ~1e-2, garbage would be ~1).
    max_err = float(jnp.max(jnp.abs(out - ref)))
    assert jnp.allclose(out, ref, atol=5e-2, rtol=5e-2), max_err

    print("KERNEL_OK")
</pallas_src>

<mosaic_0001>
module attributes {stable_mosaic.version = 11 : i64} {
  func.func @_conv_stats_kernel(%arg0: i32, %arg1: i32, %arg2: memref<1x36x256xbf16, #tpu.memory_space<vmem>>, %arg3: memref<8x36xbf16, #tpu.memory_space<vmem>>, %arg4: memref<1x8x256xbf16, #tpu.memory_space<vmem>>, %arg5: memref<1x1x8x1xf32, #tpu.memory_space<vmem>>, %arg6: memref<1x1x8x1xf32, #tpu.memory_space<vmem>>) attributes {dimension_semantics = [#tpu.dimension_semantics<parallel>, #tpu.dimension_semantics<parallel>], iteration_bounds = array<i64: 2, 1>, scalar_prefetch = 0 : i64, scratch_operands = 0 : i64, tpu.core_type = #tpu.core_type<tc>, window_params = [{transform_indices = @transform_0, window_bounds = array<i64: 1, 36, 256>}, {pipeline_mode = #tpu.pipeline_mode<synchronous>, transform_indices = @transform_1, window_bounds = array<i64: 8, 36>}, {transform_indices = @transform_2, window_bounds = array<i64: 1, 8, 256>}, {transform_indices = @transform_3, window_bounds = array<i64: 1, 1, 8, 1>}, {transform_indices = @transform_4, window_bounds = array<i64: 1, 1, 8, 1>}]} {
    %c0 = arith.constant 0 : index
    %c0_0 = arith.constant 0 : index
    %0 = vector.load %arg3[%c0, %c0_0] : memref<8x36xbf16, #tpu.memory_space<vmem>>, vector<8x36xbf16>
    %c0_1 = arith.constant 0 : index
    %c0_2 = arith.constant 0 : index
    %c0_3 = arith.constant 0 : index
    %1 = vector.load %arg2[%c0_1, %c0_2, %c0_3] : memref<1x36x256xbf16, #tpu.memory_space<vmem>>, vector<1x36x256xbf16>
    %2 = vector.shape_cast %1 : vector<1x36x256xbf16> to vector<36x256xbf16>
    %cst = arith.constant dense<0.000000e+00> : vector<8x256xf32>
    %3 = tpu.matmul %0, %2, %cst {dimension_numbers = #tpu.dot_dimension_numbers<[1], [0], [0], [1], [0, 0, 1, 1], [], []>} : vector<8x36xbf16>, vector<36x256xbf16>, vector<8x256xf32> -> vector<8x256xf32>
    %cst_4 = arith.constant dense<0.000000e+00> : vector<8xf32>
    %4 = vector.multi_reduction <add>, %3, %cst_4 [1] : vector<8x256xf32> to vector<8xf32>
    %5 = vector.shape_cast %4 : vector<8xf32> to vector<8x1xf32>
    %c0_5 = arith.constant 0 : index
    %c0_6 = arith.constant 0 : index
    %c0_7 = arith.constant 0 : index
    %c0_8 = arith.constant 0 : index
    %6 = vector.load %arg5[%c0_5, %c0_6, %c0_7, %c0_8] : memref<1x1x8x1xf32, #tpu.memory_space<vmem>>, vector<1x1x8x1xf32>
    %7 = vector.shape_cast %6 : vector<1x1x8x1xf32> to vector<8x1xf32>
    %8 = vector.shape_cast %5 : vector<8x1xf32> to vector<1x1x8x1xf32>
    tpu.vector_store %arg5[%c0_5, %c0_6, %c0_7, %c0_8], %8 {strides = array<i32>} : memref<1x1x8x1xf32, #tpu.memory_space<vmem>>, vector<1x1x8x1xf32>,
    %9 = arith.mulf %3, %3 : vector<8x256xf32>
    %cst_9 = arith.constant dense<0.000000e+00> : vector<8xf32>
    %10 = vector.multi_reduction <add>, %9, %cst_9 [1] : vector<8x256xf32> to vector<8xf32>
    %11 = vector.shape_cast %10 : vector<8xf32> to vector<8x1xf32>
    %c0_10 = arith.constant 0 : index
    %c0_11 = arith.constant 0 : index
    %c0_12 = arith.constant 0 : index
    %c0_13 = arith.constant 0 : index
    %12 = vector.load %arg6[%c0_10, %c0_11, %c0_12, %c0_13] : memref<1x1x8x1xf32, #tpu.memory_space<vmem>>, vector<1x1x8x1xf32>
    %13 = vector.shape_cast %12 : vector<1x1x8x1xf32> to vector<8x1xf32>
    %14 = vector.shape_cast %11 : vector<8x1xf32> to vector<1x1x8x1xf32>
    tpu.vector_store %arg6[%c0_10, %c0_11, %c0_12, %c0_13], %14 {strides = array<i32>} : memref<1x1x8x1xf32, #tpu.memory_space<vmem>>, vector<1x1x8x1xf32>,
    %15 = arith.truncf %3 : vector<8x256xf32> to vector<8x256xbf16>
    %c0_14 = arith.constant 0 : index
    %c0_15 = arith.constant 0 : index
    %c0_16 = arith.constant 0 : index
    %16 = vector.load %arg4[%c0_14, %c0_15, %c0_16] : memref<1x8x256xbf16, #tpu.memory_space<vmem>>, vector<1x8x256xbf16>
    %17 = vector.shape_cast %16 : vector<1x8x256xbf16> to vector<8x256xbf16>
    %18 = vector.shape_cast %15 : vector<8x256xbf16> to vector<1x8x256xbf16>
    tpu.vector_store %arg4[%c0_14, %c0_15, %c0_16], %18 {strides = array<i32>} : memref<1x8x256xbf16, #tpu.memory_space<vmem>>, vector<1x8x256xbf16>,
    return
  }
  func.func @transform_0(%arg0: i32, %arg1: i32) -> (i32, i32, i32) {
    %c0_i32 = arith.constant 0 : i32
    %c0_i32_0 = arith.constant 0 : i32
    return %arg0, %c0_i32, %arg1 : i32, i32, i32
  }
  func.func @transform_1(%arg0: i32, %arg1: i32) -> (i32, i32) {
    %c0_i32 = arith.constant 0 : i32
    %c0_i32_0 = arith.constant 0 : i32
    %c0_i32_1 = arith.constant 0 : i32
    return %c0_i32, %c0_i32_0 : i32, i32
  }
  func.func @transform_2(%arg0: i32, %arg1: i32) -> (i32, i32, i32) {
    %c0_i32 = arith.constant 0 : i32
    %c0_i32_0 = arith.constant 0 : i32
    return %arg0, %c0_i32, %arg1 : i32, i32, i32
  }
  func.func @transform_3(%arg0: i32, %arg1: i32) -> (i32, i32, i32, i32) {
    %c0_i32 = arith.constant 0 : i32
    %c0_i32_0 = arith.constant 0 : i32
    %c0_i32_1 = arith.constant 0 : i32
    return %arg0, %arg1, %c0_i32, %c0_i32_0 : i32, i32, i32, i32
  }
  func.func @transform_4(%arg0: i32, %arg1: i32) -> (i32, i32, i32, i32) {
    %c0_i32 = arith.constant 0 : i32
    %c0_i32_0 = arith.constant 0 : i32
    %c0_i32_1 = arith.constant 0 : i32
    return %arg0, %arg1, %c0_i32, %c0_i32_0 : i32, i32, i32, i32
  }
}

module attributes {stable_mosaic.version = 11 : i64} {
  func.func @_bn_relu_kernel(%arg0: i32, %arg1: i32, %arg2: memref<1x8x256xbf16, #tpu.memory_space<vmem>>, %arg3: memref<1x8x1xf32, #tpu.memory_space<vmem>>, %arg4: memref<1x8x1xf32, #tpu.memory_space<vmem>>, %arg5: memref<1x8x256xf32, #tpu.memory_space<vmem>>) attributes {dimension_semantics = [#tpu.dimension_semantics<parallel>, #tpu.dimension_semantics<parallel>], iteration_bounds = array<i64: 2, 1>, scalar_prefetch = 0 : i64, scratch_operands = 0 : i64, tpu.core_type = #tpu.core_type<tc>, window_params = [{transform_indices = @transform_0, window_bounds = array<i64: 1, 8, 256>}, {pipeline_mode = #tpu.pipeline_mode<synchronous>, transform_indices = @transform_1, window_bounds = array<i64: 1, 8, 1>}, {pipeline_mode = #tpu.pipeline_mode<synchronous>, transform_indices = @transform_2, window_bounds = array<i64: 1, 8, 1>}, {transform_indices = @transform_3, window_bounds = array<i64: 1, 8, 256>}]} {
    %c0 = arith.constant 0 : index
    %c0_0 = arith.constant 0 : index
    %c0_1 = arith.constant 0 : index
    %0 = vector.load %arg2[%c0, %c0_0, %c0_1] : memref<1x8x256xbf16, #tpu.memory_space<vmem>>, vector<1x8x256xbf16>
    %1 = arith.extf %0 : vector<1x8x256xbf16> to vector<1x8x256xf32>
    %c0_2 = arith.constant 0 : index
    %c0_3 = arith.constant 0 : index
    %c0_4 = arith.constant 0 : index
    %2 = vector.load %arg3[%c0_2, %c0_3, %c0_4] : memref<1x8x1xf32, #tpu.memory_space<vmem>>, vector<1x8x1xf32>
    %3 = vector.broadcast %2 : vector<1x8x1xf32> to vector<1x8x256xf32>
    %4 = arith.mulf %1, %3 : vector<1x8x256xf32>
    %c0_5 = arith.constant 0 : index
    %c0_6 = arith.constant 0 : index
    %c0_7 = arith.constant 0 : index
    %5 = vector.load %arg4[%c0_5, %c0_6, %c0_7] : memref<1x8x1xf32, #tpu.memory_space<vmem>>, vector<1x8x1xf32>
    %6 = vector.broadcast %5 : vector<1x8x1xf32> to vector<1x8x256xf32>
    %7 = arith.addf %4, %6 : vector<1x8x256xf32>
    %cst = arith.constant 0.000000e+00 : f32
    %8 = vector.broadcast %cst : f32 to vector<1x8x256xf32>
    %9 = arith.maximumf %7, %8 : vector<1x8x256xf32>
    %c0_8 = arith.constant 0 : index
    %c0_9 = arith.constant 0 : index
    %c0_10 = arith.constant 0 : index
    %10 = vector.load %arg5[%c0_8, %c0_9, %c0_10] : memref<1x8x256xf32, #tpu.memory_space<vmem>>, vector<1x8x256xf32>
    tpu.vector_store %arg5[%c0_8, %c0_9, %c0_10], %9 {strides = array<i32>} : memref<1x8x256xf32, #tpu.memory_space<vmem>>, vector<1x8x256xf32>,
    return
  }
  func.func @transform_0(%arg0: i32, %arg1: i32) -> (i32, i32, i32) {
    %c0_i32 = arith.constant 0 : i32
    %c0_i32_0 = arith.constant 0 : i32
    return %arg0, %c0_i32, %arg1 : i32, i32, i32
  }
  func.func @transform_1(%arg0: i32, %arg1: i32) -> (i32, i32, i32) {
    %c0_i32 = arith.constant 0 : i32
    %c0_i32_0 = arith.constant 0 : i32
    %c0_i32_1 = arith.constant 0 : i32
    %c0_i32_2 = arith.constant 0 : i32
    return %c0_i32, %c0_i32_0, %c0_i32_1 : i32, i32, i32
  }
  func.func @transform_2(%arg0: i32, %arg1: i32) -> (i32, i32, i32) {
    %c0_i32 = arith.constant 0 : i32
    %c0_i32_0 = arith.constant 0 : i32
    %c0_i32_1 = arith.constant 0 : i32
    %c0_i32_2 = arith.constant 0 : i32
    return %c0_i32, %c0_i32_0, %c0_i32_1 : i32, i32, i32
  }
  func.func @transform_3(%arg0: i32, %arg1: i32) -> (i32, i32, i32) {
    %c0_i32 = arith.constant 0 : i32
    %c0_i32_0 = arith.constant 0 : i32
    return %arg0, %c0_i32, %arg1 : i32, i32, i32
  }
}

</mosaic_0001>

<bundles_post_ra>
// kernel: convolution_forward.3
= control target key start
LH: loop header
LB: loop body
LE: loop exit
PB: predicated region body
PF: predicated region fallthrough
CT: control target
= control target key end

     0   :  { %s404_s12 = smov 0   ;;  %s406_s13 = smov 0   ;;  %s443_s0 = inlined_call_operand.vmem [shape: bf16[2,8,256], index: 0, kind: input, shape index: {}]   ;;  %s444_s1 = inlined_call_operand.vmem [shape: f32[1,8,1], index: 1, kind: input, shape index: {}]   ;;  %s445_s2 = inlined_call_operand.vmem [shape: f32[1,8,1], index: 2, kind: input, shape index: {}]   ;;  %s446_s3 = inlined_call_operand.vmem [shape: f32[2,8,256], index: 3, kind: output, shape index: {}]  }
   0x1   :  { %s408_s14 = smov 0  }
   0x2 LB: > { %s25_s15 = sadd.s32 1, %s377_s13  ;;  %p324_p0 = scmp.ge.s32.totalorder %s381_s14, 1  ;;  %s381_s14 = sphi %s408_s14, %s13_s14   ;;  %s377_s13 = sphi %s406_s13, %s448_s13   ;;  %s373_s12 = sphi %s404_s12, %s447_s12  }
   0x3   : > { %p27_p1 = scmp.ge.s32.totalorder %s25_s15, 2  ;;  %p158_p2 = scmp.lt.s32.totalorder %s381_s14, 3 }
   0x5   : > { %s450_s15 = smov (%p27_p1, %s25_s15), 0  ;;  %p159_p3 = pnand %p324_p0, %p158_p2 }
   0x6   : > { %v213_v0 = vld [vmem:[%s444_s1] sm:$0xff] (!%p159_p3)  ;;  %v383_v1 = vmov (!%p159_p3), 0   ;;  %p191_p4 = scmp.lt.s32.totalorder (!%p159_p3), %s373_s12, 1 }
   0x7   : > { %162 = sbr.rel (%p159_p3) target bundleno = 145 (0x91), region = 32  ;;  %358 = vset.pattern.permute.xlu0 (!%p159_p3), %v383_v1  ;;  %v221_v2 = vld [vmem:[%s445_s2] sm:$0xff] (!%p159_p3) }
   0x8   : > { %216 = vperm.xlu0 (!%p159_p3), %358, %v213_v0  }
   0xc   : > { %224 = vperm.xlu0 (!%p159_p3), %358, %v221_v2  }
   0xe   : > { %s452_s12 = smov (!%p191_p4, %s373_s12), 1 }
   0xf   : > { %s331_s20 = sshll.u32 %s452_s12, 3  ;;  %s332_s24 = sshll.u32 %s452_s12, 4 }
  0x10   : > { %s198_s23 = scalar_lea.vmem %s443_s0, %s331_s20  ;;  %s208_s27 = scalar_lea.vmem %s446_s3, %s332_s24 }
  0x11   : > { %v210_v3 = vld [vmem:[%s198_s23] sm:$0xff] }
  0x12   : > { %v211_v4 = vunpack.c.l.bf16 %v210_v3  ;;  %v212_v5 = vunpack.c.h.bf16 %v210_v3 }
  0x87   : > { %v217_v6 = vpop.permute.xlu0 %216 }
  0x88   : > { %v219_v7 = vmul.f32 %v217_v6, %v211_v4  ;;  %v220_v8 = vmul.f32 %v217_v6, %v212_v5 }
  0x8b   : > { %v225_v9 = vpop.permute.xlu0 %224 }
  0x8c   : > { %v227_v10 = vadd.f32 %v225_v9, %v219_v7  ;;  %v228_v11 = vadd.f32 %v225_v9, %v220_v8 }
  0x8e   : > { %v229_v12 = vmax.f32 %v227_v10, 0.0  ;;  %v230_v13 = vmax.f32 %v228_v11, 0.0 }
  0x90   : > { %231 = vst [vmem:[%s208_s27] sm:$0xff] %v229_v12  ;;  %232 = vst [vmem:[%s208_s27 + $0x8] sm:$0xff] %v230_v13 }
  0x91 PF: > { %s13_s14 = sadd.s32 1, %s381_s14   ;;  %s447_s12 = smov %s377_s13 }
  0x92   : > { %p10_p5 = scmp.ge.s32.totalorder %s13_s14, 4   ;;  %s448_s13 = smov %s450_s15 }
  0x94   :  { %12 = sbr.rel (!%p10_p5) target bundleno = 2 (0x2), region = 62 }

// kernel: convolution_forward.2
= control target key start
LH: loop header
LB: loop body
LE: loop exit
PB: predicated region body
PF: predicated region fallthrough
CT: control target
= control target key end

     0   :  { %s654_s15 = smov 0   ;;  %s656_s16 = smov 0   ;;  %s696_s0 = inlined_call_operand.vmem [shape: bf16[2,36,256], index: 0, kind: input, shape index: {}]   ;;  %s697_s1 = inlined_call_operand.vmem [shape: bf16[8,36], index: 1, kind: input, shape index: {}]   ;;  %s698_s2 = inlined_call_operand.vmem [shape: bf16[2,8,256], index: 2, kind: output, shape index: {0}]   ;;  %s699_s3 = inlined_call_operand.vmem [shape: f32[2,1,8,1], index: 3, kind: output, shape index: {1}]   ;;  %s700_s4 = inlined_call_operand.vmem [shape: f32[2,1,8,1], index: 4, kind: output, shape index: {2}]  }
   0x1   :  { %s658_s17 = smov 0  }
   0x2 LB: > { %s27_s18 = sadd.s32 1, %s622_s16  ;;  %p551_p0 = scmp.ge.s32.totalorder %s626_s17, 1  ;;  %s626_s17 = sphi %s658_s17, %s15_s17   ;;  %s622_s16 = sphi %s656_s16, %s702_s16   ;;  %s618_s15 = sphi %s654_s15, %s701_s15  }
   0x3   : > { %p29_p1 = scmp.ge.s32.totalorder %s27_s18, 2  ;;  %p192_p2 = scmp.lt.s32.totalorder %s626_s17, 3 }
   0x5   : > { %s704_s18 = smov (%p29_p1, %s27_s18), 0  ;;  %p193_p3 = pnand %p551_p0, %p192_p2 }
   0x6   : > { %p241_p4 = scmp.lt.s32.totalorder (!%p193_p3), %s618_s15, 1  ;;  %v628_v0 = vmov (!%p193_p3), 0   ;;  %vm310_vm0 = vcmask (!%p193_p3), 1041408   ;;  %v275_v9 = vld [vmem:[%s697_s1] sm:$0xf] (!%p193_p3)  ;;  %vm306_vm1 = vcmask (!%p193_p3), 293888  }
   0x7   : > { %196 = sbr.rel (%p193_p3) target bundleno = 393 (0x189), region = 28  ;;  %349 = vmatprep.mubr.bf16.mxu0 (!%p193_p3), %v628_v0  ;;  %vm361_vm2 = vcmask (!%p193_p3), 7168  }
   0xe   : > { %s706_s15 = smov (!%p241_p4, %s618_s15), 1 }
   0xf   : > { %s570_s19 = smul.u32 40, %s706_s15  ;;  %s568_s25 = sshll.u32 %s706_s15, 3 }
  0x10   : > { %s258_s28 = scalar_lea.vmem %s698_s2, %s568_s25  ;;  %s266_s5 = scalar_lea.vmem %s699_s3, %s568_s25 }
  0x11   : > { %s248_s22 = scalar_lea.vmem %s696_s0, %s570_s19  ;;  %s273_s8 = scalar_lea.vmem %s700_s4, %s568_s25 }
  0x12   : > { %v596_v1 = vld [vmem:[%s248_s22 + $0x4] ss:$8 sps:$4 sm:$0xff]   ;;  %v598_v2 = vld [vmem:[%s248_s22] ss:$8 sps:$4 sm:$0xff]   ;;  %v599_v3 = vld [vmem:[%s248_s22 + $0x14] ss:$8 sps:$4 sm:$0xff]  }
  0x13   : > { %317 = vmatprep.subr.bf16.mxu0 %v596_v1  ;;  %v280_v4 = vld [vmem:[%s248_s22 + $0x20] sm:$0x33]  ;;  %v601_v5 = vld [vmem:[%s248_s22 + $0x10] ss:$8 sps:$4 sm:$0xff]  }
  0x14   : > { %318 = vmatpush1.bf16.msra.mxu0 %v598_v2  ;;  %v562_v6 = vcombine.high %v280_v4, %v280_v4  ;;  %v561_v7 = vcombine.low %v280_v4, %v280_v4 }
  0x15   : > { %319 = vmatprep.subr.bf16.mxu0 %v599_v3 }
  0x16   : > { %v312_v8 = vsel %vm310_vm0, %v561_v7, 0 }
  0x18   : > { %320 = vmatpush1.bf16.msra.mxu0 %v601_v5 }
  0x19   : > { %563 = vmatprep.subr.msk.bf16.mxu0 %vm310_vm0, %v562_v6 }
  0x1c   : > { %322 = vmatpush1.bf16.msra.mxu0 %v312_v8 }
  0x1f   : > { %564 = vmatmul.mubr.msk.bf16.vlgmr.msra.gmra.mrb[0].mxu0 %vm306_vm1, %v275_v9 }
  0xf2   : > { %v351_v10 = vpop.f32.mrb[0].mxu0 }
  0xf3   : > { %v353_v11 = vpop.f32.mrb[1].mxu0  ;;  %v363_v12 = vmul.f32 %v351_v10, %v351_v10 }
  0xf4   : > { %v569_v13 = vpack.c.bf16 %v353_v11, %v351_v10  ;;  %v355_v14 = vpop.f32.mrb[2].mxu0  ;;  %v358_v15 = vadd.f32 %v353_v11, %v351_v10  ;;  %v364_v16 = vmul.f32 %v353_v11, %v353_v11 }
  0xf5   : > { %v356_v17 = vpop.f32.mrb[3].mxu0 }
  0xf6   : > { %377 = vst [vmem:[%s258_s28] sm:$0xff] %v569_v13  ;;  %359 = vadd.xlane.f32.xlu0 %v358_v15  ;;  %v365_v18 = vadd.f32 %v364_v16, %v363_v12 }
  0xfa   : > { %366 = vadd.xlane.f32.xlu0 %v365_v18 }
 0x183   : > { %v360_v19 = vpop.xlane.xlu0 %359 }
 0x184   : > { %362 = vst.msk [vmem:[%s266_s5] sm:$0xff] %vm361_vm2, %v360_v19 }
 0x187   : > { %v367_v20 = vpop.xlane.xlu0 %366 }
 0x188   : > { %368 = vst.msk [vmem:[%s273_s8] sm:$0xff] %vm361_vm2, %v367_v20 }
 0x189 PF: > { %s15_s17 = sadd.s32 1, %s626_s17   ;;  %s701_s15 = smov %s622_s16 }
 0x18a   : > { %p12_p5 = scmp.ge.s32.totalorder %s15_s17, 4   ;;  %s702_s16 = smov %s704_s18 }
 0x18c   :  { %14 = sbr.rel (!%p12_p5) target bundleno = 2 (0x2), region = 82 }

</bundles_post_ra>
